<compile_context>
chip_gen: v7x
topology: tpu7x:2x2x1
jax: 0.10.0
libtpu: 0.0.40
codegen_flags: <defaults>
</compile_context>

<pallas_src>
import functools

import jax
import jax.numpy as jnp
from jax import lax
from jax.experimental import pallas as pl
from jax.experimental.pallas import tpu as pltpu

LANES = 128
POOL_AFTER = frozenset({1, 3, 6, 9, 12})   # conv indices followed by a 2x2 maxpool


def _round_up(x, m):
    return (x + m - 1) // m * m


def _pick_div(n, candidates):
    for c in candidates:
        if c <= n and n % c == 0:
            return c
    raise ValueError(f"no tile candidate divides {n}")


def _pick_th(ho, w, s, cap=2048):
    """Largest row-tile TH dividing ho with S*TH*W (matmul M) <= cap."""
    t_max = max(1, min(ho, cap // max(1, s * w)))
    for t in range(t_max, 0, -1):
        if ho % t == 0:
            return t
    return 1


def _cparams(dims, block_bytes):
    limit = int(min(48 * 1024 * 1024,
                    max(16 * 1024 * 1024, 3 * int(block_bytes) + (4 << 20))))
    return pltpu.CompilerParams(dimension_semantics=dims, vmem_limit_bytes=limit)


# ----------------------------------------------------------------------------
# Fused conv3x3 + bias + ReLU (+ 2x2 maxpool) + sparsity kernel
# ----------------------------------------------------------------------------
def _conv_kernel(xu_ref, xm_ref, xd_ref, w_ref, b_ref,
                 act_ref, map_ref, cnt_ref, *, TH, W, Wo, Cout, pool):
    h = pl.program_id(1)
    nh = pl.num_programs(1)
    R = (2 * TH) if pool else TH
    Cout_p = act_ref.shape[-1]

    # 1-row H halos (masked to zero at the image top/bottom).
    up = xu_ref[0, 0] * (h > 0).astype(xu_ref.dtype)            # (W+2, Cin_p)
    dn = xd_ref[0, 0] * (h < nh - 1).astype(xd_ref.dtype)
    xin = jnp.concatenate([up[None], xm_ref[0], dn[None]], axis=0)  # (R+2, W+2, Cin_p)

    # 3 MXU matmuls: M = R*W, K = 3*Cin_p (kw folded into the contraction).
    acc = None
    for kh in range(3):
        lhs = jnp.concatenate(
            [xin[kh:kh + R, kw:kw + W, :] for kw in range(3)], axis=-1)
        lhs = lhs.reshape(R * W, lhs.shape[-1])
        p = jnp.dot(lhs, w_ref[kh], preferred_element_type=jnp.float32)
        acc = p if acc is None else acc + p

    act = jnp.maximum(acc + b_ref[...], 0.0)                     # (R*W, Cout_p) f32
    act = act.reshape(R, W, Cout_p)
    if pool:
        act = jnp.max(act.reshape(TH, 2, W, Cout_p), axis=1)     # row pairs
        act = jnp.max(act.reshape(TH, Wo, 2, Cout_p), axis=2)    # col pairs

    # sparsity epilogue on the f32 values (padded lanes excluded)
    lane = lax.broadcasted_iota(jnp.int32, act.shape, 2)
    z = jnp.logical_and(act == 0.0, lane < Cout)
    map_ref[0] = z.astype(jnp.int8)
    cnt_ref[0, 0] = jnp.sum(z.astype(jnp.int32))

    # bf16 activation written with its zero W-halo columns (ready for next layer)
    zcol = jnp.zeros((TH, 1, Cout_p), act_ref.dtype)
    act_ref[0, :, 1:Wo + 1, :] = act.astype(act_ref.dtype)
    act_ref[0, :, 0:1, :] = zcol
    act_ref[0, :, Wo + 1:Wo + 2, :] = zcol


def conv3x3_block(x, cp, *, pool):
    """Fused 3x3/pad-1 conv + bias + ReLU (+ 2x2/2 max-pool) + sparsity epilogue.

    x: (N, Hin, W+2, Cin_p) bf16 with zero W-halo columns and zero-padded channels.
    Returns (act (N,Ho,Wo+2,Cout_p) bf16, zmap (N,Ho,Wo,Cout_p) int8, zero_count).
    """
    N, Hin, Wcols, Cin_p = x.shape
    W = Wcols - 2
    assert Cin_p == cp["cin_p"]
    Cout, Cout_p = cp["cout"], cp["cout_p"]
    S = 2 if pool else 1
    Ho, Wo = Hin // S, W // S
    TH = _pick_th(Ho, W, S)
    R = S * TH
    nh = Ho // TH

    def up_map(n, h):
        return (n, jnp.maximum(S * TH * h - 1, 0), 0, 0)

    def dn_map(n, h):
        return (n, jnp.minimum(S * TH * (h + 1), Hin - 1), 0, 0)

    in_specs = [
        pl.BlockSpec((1, 1, Wcols, Cin_p), up_map),
        pl.BlockSpec((1, R, Wcols, Cin_p), lambda n, h: (n, h, 0, 0)),
        pl.BlockSpec((1, 1, Wcols, Cin_p), dn_map),
        pl.BlockSpec((3, 3 * Cin_p, Cout_p), lambda n, h: (0, 0, 0)),
        pl.BlockSpec((1, Cout_p), lambda n, h: (0, 0)),
    ]
    out_specs = (
        pl.BlockSpec((1, TH, Wo + 2, Cout_p), lambda n, h: (n, h, 0, 0)),
        pl.BlockSpec((1, TH, Wo, Cout_p), lambda n, h: (n, h, 0, 0)),
        pl.BlockSpec((1, 1), lambda n, h: (n, h),
                     memory_space=pltpu.MemorySpace.SMEM),
    )
    out_shape = (
        jax.ShapeDtypeStruct((N, Ho, Wo + 2, Cout_p), jnp.bfloat16),
        jax.ShapeDtypeStruct((N, Ho, Wo, Cout_p), jnp.int8),
        jax.ShapeDtypeStruct((N, nh), jnp.int32),
    )
    kern = functools.partial(_conv_kernel, TH=TH, W=W, Wo=Wo, Cout=Cout, pool=pool)
    M = R * W
    block_bytes = ((R + 4) * Wcols * Cin_p * 2
                   + 9 * Cin_p * Cout_p * 2 + Cout_p * 4
                   + TH * (Wo + 2) * Cout_p * 2 + TH * Wo * Cout_p
                   + M * (3 * Cin_p * 2 + Cout_p * 4))
    act, zmap, cnt = pl.pallas_call(
        kern,
        out_shape=out_shape,
        grid=(N, nh),
        in_specs=in_specs,
        out_specs=out_specs,
        compiler_params=_cparams(("parallel", "parallel"), block_bytes),
    )(x, x, x, cp["w"], cp["b"])
    return act, zmap, jnp.sum(cnt)


# ----------------------------------------------------------------------------
# K/N-tiled FC matmul (bf16 in / f32 acc) + bias (+ReLU) (+ sparsity epilogue)
# ----------------------------------------------------------------------------
def _fc_kernel(x_ref, w_ref, b_ref, *rest, relu, Nout, with_sparsity):
    if with_sparsity:
        act_ref, map_ref, cnt_ref, acc_ref = rest
    else:
        act_ref, acc_ref = rest
    j = pl.program_id(1)
    k = pl.program_id(2)
    nk = pl.num_programs(2)

    @pl.when(k == 0)
    def _():
        acc_ref[...] = jnp.zeros_like(acc_ref)

    acc_ref[...] += jnp.dot(x_ref[...], w_ref[...],
                            preferred_element_type=jnp.float32)

    @pl.when(k == nk - 1)
    def _():
        a = acc_ref[...] + b_ref[...]
        if relu:
            a = jnp.maximum(a, 0.0)
        act_ref[...] = a
        if with_sparsity:
            tn = a.shape[1]
            lane = lax.broadcasted_iota(jnp.int32, a.shape, 1) + j * tn
            z = jnp.logical_and(a == 0.0, lane < Nout)
            map_ref[...] = z.astype(jnp.int8)
            cnt_ref[0, 0] = jnp.sum(z.astype(jnp.int32))


def fc_block(x, fp, *, relu, with_sparsity):
    M = x.shape[0]
    K, Kp, Nout, Np = fp["k"], fp["kp"], fp["nout"], fp["np"]
    xb = x.astype(jnp.bfloat16)
    if Kp != K:
        xb = jnp.pad(xb, ((0, 0), (0, Kp - K)))
    tm = M
    tk = _pick_div(Kp, (2048, 1024, 512, 256, 128))
    tn = _pick_div(Np, (1024, 512, 256, 128))
    grid = (M // tm, Np // tn, Kp // tk)

    in_specs = [
        pl.BlockSpec((tm, tk), lambda i, j, k: (i, k)),
        pl.BlockSpec((tk, tn), lambda i, j, k: (k, j)),
        pl.BlockSpec((1, tn), lambda i, j, k: (0, j)),
    ]
    out_specs = [pl.BlockSpec((tm, tn), lambda i, j, k: (i, j))]
    out_shape = [jax.ShapeDtypeStruct((M, Np), jnp.float32)]
    if with_sparsity:
        out_specs += [
            pl.BlockSpec((tm, tn), lambda i, j, k: (i, j)),
            pl.BlockSpec((1, 1), lambda i, j, k: (i, j),
                         memory_space=pltpu.MemorySpace.SMEM),
        ]
        out_shape += [
            jax.ShapeDtypeStruct((M, Np), jnp.int8),
            jax.ShapeDtypeStruct((grid[0], grid[1]), jnp.int32),
        ]
    kern = functools.partial(_fc_kernel, relu=relu, Nout=Nout,
                             with_sparsity=with_sparsity)
    block_bytes = tm * tk * 2 + 2 * tk * tn * 2 + tn * 4 + tm * tn * 9
    outs = pl.pallas_call(
        kern,
        out_shape=tuple(out_shape),
        grid=grid,
        in_specs=in_specs,
        out_specs=tuple(out_specs),
        scratch_shapes=[pltpu.VMEM((tm, tn), jnp.float32)],
        compiler_params=_cparams(("parallel", "parallel", "arbitrary"), block_bytes),
    )(xb, fp["w"], fp["b"])
    if with_sparsity:
        act, zmap, cnt = outs
        return act, zmap, jnp.sum(cnt)
    return outs[0]


# ----------------------------------------------------------------------------
# Standalone (tiled) sparsity kernel for the raw-input checkpoint L1
# ----------------------------------------------------------------------------
def _input_sparsity_kernel(x_ref, map_ref, cnt_ref):
    z = (x_ref[...] == 0.0)
    map_ref[...] = z.astype(jnp.int8)
    cnt_ref[0, 0] = jnp.sum(z.astype(jnp.int32))


def input_sparsity(x):
    """L1 checkpoint on the raw NCHW input (flat order already matches .view(-1))."""
    flat = x.reshape(-1)
    n = flat.shape[0]
    n_pad = _round_up(n, 32 * LANES)
    if n_pad != n:
        flat = jnp.concatenate([flat, jnp.ones((n_pad - n,), flat.dtype)])  # pad != 0
    rows = n_pad // LANES
    tr = _pick_div(rows, (1024, 512, 256, 128, 64, 32))
    nblk = rows // tr
    x2 = flat.reshape(rows, LANES)
    block_bytes = tr * LANES * 5
    zmap, cnt = pl.pallas_call(
        _input_sparsity_kernel,
        out_shape=(jax.ShapeDtypeStruct((rows, LANES), jnp.int8),
                   jax.ShapeDtypeStruct((nblk, 1), jnp.int32)),
        grid=(nblk,),
        in_specs=[pl.BlockSpec((tr, LANES), lambda i: (i, 0))],
        out_specs=(pl.BlockSpec((tr, LANES), lambda i: (i, 0)),
                   pl.BlockSpec((1, 1), lambda i: (i, 0),
                                memory_space=pltpu.MemorySpace.SMEM)),
        compiler_params=_cparams(("parallel",), block_bytes),
    )(x2)
    smap = zmap.reshape(-1)[:n].astype(jnp.uint8)
    return jnp.sum(cnt), int(n), smap


# ----------------------------------------------------------------------------
# One-time parameter preparation (hoisted out of forward)
# ----------------------------------------------------------------------------
def prepare_params(params):
    convs = []
    for (w, b) in params["convs"]:
        Cout, Cin = w.shape[0], w.shape[1]
        Cin_p = _round_up(Cin, LANES)
        Cout_p = _round_up(Cout, LANES)
        wt = jnp.transpose(w, (2, 3, 1, 0))                        # (3,3,Cin,Cout)
        wt = jnp.pad(wt, ((0, 0), (0, 0), (0, Cin_p - Cin), (0, Cout_p - Cout)))
        wt = wt.reshape(3, 3 * Cin_p, Cout_p).astype(jnp.bfloat16)  # (kh, kw*Cin_p, Cout_p)
        bp = jnp.pad(b, (0, Cout_p - Cout)).reshape(1, Cout_p).astype(jnp.float32)
        convs.append(dict(w=wt, b=bp, cin=Cin, cin_p=Cin_p, cout=Cout, cout_p=Cout_p))
    fcs = []
    for (w, b) in params["fcs"]:
        K, Nout = w.shape
        Kp = _round_up(K, LANES)
        Np = _round_up(Nout, LANES)
        wp = jnp.pad(w, ((0, Kp - K), (0, Np - Nout))).astype(jnp.bfloat16)
        bp = jnp.pad(b, (0, Np - Nout)).reshape(1, Np).astype(jnp.float32)
        fcs.append(dict(w=wp, b=bp, k=K, kp=Kp, nout=Nout, np=Np))
    return dict(convs=convs, fcs=fcs)


def prep_input(x_nchw, cin_p):
    """NCHW f32 -> NHWC bf16 with zero W-halo columns and zero channel padding."""
    _, C, _, _ = x_nchw.shape
    x = jnp.transpose(x_nchw, (0, 2, 3, 1))
    x = jnp.pad(x, ((0, 0), (0, 0), (1, 1), (0, cin_p - C)))
    return x.astype(jnp.bfloat16)


# ----------------------------------------------------------------------------
# VGG16 forward (mirrors the 15 sparsity checkpoints of the PyTorch module)
# ----------------------------------------------------------------------------
def forward(prep, x_nchw):
    zeros_list, sizes_list, smaps = [], [], []

    # L1: raw input
    z, s, m = input_sparsity(x_nchw)
    zeros_list.append(z); sizes_list.append(s); smaps.append(m)

    # conv stack: bf16 NHWC activations with W-halo and 128-padded channels carried
    # between layers (written directly by the kernels; no glue pad/cast passes).
    x = prep_input(x_nchw, prep["convs"][0]["cin_p"])
    for li, cp in enumerate(prep["convs"]):
        act, zmap, zcnt = conv3x3_block(x, cp, pool=(li in POOL_AFTER))
        N_, Ho, Wcols_o, _ = act.shape
        Wo = Wcols_o - 2
        zeros_list.append(zcnt)                                    # L2..L14
        sizes_list.append(N_ * Ho * Wo * cp["cout"])
        # reorder only the 1-byte map to the PyTorch NCHW .view(-1) order
        smaps.append(zmap[..., :cp["cout"]].transpose(0, 3, 1, 2)
                     .reshape(-1).astype(jnp.uint8))
        x = act

    # flatten point: NHWC -> NCHW order for the classifier (tiny tensor)
    last = prep["convs"][-1]
    xf = x[:, :, 1:-1, :last["cout"]].transpose(0, 3, 1, 2).reshape(x.shape[0], -1)

    fcs = prep["fcs"]
    # classifier[0..2]: Linear + ReLU + Dropout  (L15 checkpoint)
    # TODO(synk): Dropout reproduced as identity (eval-mode); training-mode RNG not modeled.
    h1 = fcs[0]["nout"]
    act1, zmap1, zcnt1 = fc_block(xf, fcs[0], relu=True, with_sparsity=True)
    zeros_list.append(zcnt1)
    sizes_list.append(act1.shape[0] * h1)
    smaps.append(zmap1[:, :h1].reshape(-1).astype(jnp.uint8))

    # classifier[3..6]: Linear + ReLU + Dropout + Linear
    h2 = fcs[1]["nout"]
    x2 = fc_block(act1[:, :h1], fcs[1], relu=True, with_sparsity=False)
    ncls = fcs[2]["nout"]
    logits = fc_block(x2[:, :h2], fcs[2], relu=False, with_sparsity=False)[:, :ncls]

    sparsity_map_total = jnp.concatenate(smaps, axis=0)
    return logits, zeros_list, sizes_list, sparsity_map_total


# ----------------------------------------------------------------------------
# Deterministic parameter init (synthetic weights, no checkpoint loading)
# NOTE: the unused my_fc1..my_fc16 probe layers of the PyTorch module are never
# called in forward(), so they are not materialized here.
# ----------------------------------------------------------------------------
def init_params(key, cfg, in_ch, hidden, num_classes, feat_dim):
    convs = []
    c_in = in_ch
    k = key
    for v in cfg:
        if v == "M":
            continue
        k, kw, kb = jax.random.split(k, 3)
        fan_in = c_in * 9
        w = jax.random.normal(kw, (v, c_in, 3, 3), jnp.float32) * jnp.sqrt(2.0 / fan_in)
        b = jax.random.normal(kb, (v,), jnp.float32) * 0.01
        convs.append((w, b))
        c_in = v
    fcs = []
    for din, dout in [(feat_dim, hidden), (hidden, hidden), (hidden, num_classes)]:
        k, kw, kb = jax.random.split(k, 3)
        w = jax.random.normal(kw, (din, dout), jnp.float32) * jnp.sqrt(2.0 / din)
        b = jax.random.normal(kb, (dout,), jnp.float32) * 0.01
        fcs.append((w, b))
    return {"convs": convs, "fcs": fcs}


if __name__ == "__main__":
    # Scaled-down VGG16 (channels /8, spatial 32x32): same layer structure,
    # same 15 sparsity checkpoints, small enough to run quickly.
    N, Cin, H, W = 2, 3, 32, 32
    cfg = [8, 8, "M", 16, 16, "M", 32, 32, 32, "M", 64, 64, 64, "M", 64, 64, 64, "M"]
    hidden, num_classes = 128, 32
    feat_dim = 64 * (H // 32) * (W // 32)

    key = jax.random.PRNGKey(0)
    kx, kp = jax.random.split(key)
    x = jax.random.normal(kx, (N, Cin, H, W), jnp.float32)
    params = init_params(kp, cfg, Cin, hidden, num_classes, feat_dim)
    prep = prepare_params(params)          # one-time weight prep, hoisted out of forward

    logits, zeros_list, sizes_list, smap_total = forward(prep, x)
    logits = jax.block_until_ready(logits)
    smap_total = jax.block_until_ready(smap_total)
    zeros_list = [int(z) for z in zeros_list]

    # --- structural checks ---
    assert logits.shape == (N, num_classes)
    assert smap_total.dtype == jnp.uint8
    assert int(smap_total.shape[0]) == sum(sizes_list)
    assert len(zeros_list) == 15 and len(sizes_list) == 15
    assert zeros_list[0] == int(jnp.sum(x == 0.0))
    assert sizes_list[0] == x.size

    # --- numerical checks (bf16 MXU inputs / bf16 activations vs f32 reference) ---
    w0, b0 = params["convs"][0]
    cp0 = prep["convs"][0]
    x_in = prep_input(x, cp0["cin_p"])
    ref = lax.conv_general_dilated(
        x, w0, (1, 1), ((1, 1), (1, 1)),
        dimension_numbers=("NCHW", "OIHW", "NCHW"),
        precision=lax.Precision.HIGHEST)
    ref = jnp.maximum(ref + b0[None, :, None, None], 0.0)

    act0, zmap0, zcnt0 = conv3x3_block(x_in, cp0, pool=False)
    got0 = act0[:, :, 1:-1, :cp0["cout"]].astype(jnp.float32).transpose(0, 3, 1, 2)
    assert bool(jnp.allclose(got0, ref, atol=6e-2, rtol=6e-2))
    # fused sparsity epilogue is consistent with the kernel's own stored activations
    assert int(zcnt0) == int(jnp.sum(got0 == 0.0))
    ref_map0 = (got0 == 0.0).astype(jnp.uint8).reshape(-1)
    got_map0 = zmap0[..., :cp0["cout"]].transpose(0, 3, 1, 2).reshape(-1).astype(jnp.uint8)
    assert bool(jnp.array_equal(got_map0, ref_map0))

    # fused conv + 2x2 max-pool path
    ref_pool = lax.reduce_window(ref, -jnp.inf, lax.max,
                                 (1, 1, 2, 2), (1, 1, 2, 2), "VALID")
    actp, zmapp, zcntp = conv3x3_block(x_in, cp0, pool=True)
    gotp = actp[:, :, 1:-1, :cp0["cout"]].astype(jnp.float32).transpose(0, 3, 1, 2)
    assert bool(jnp.allclose(gotp, ref_pool, atol=6e-2, rtol=6e-2))
    assert int(zcntp) == int(jnp.sum(gotp == 0.0))

    # FC kernel vs f32 reference
    xt = jax.random.normal(jax.random.PRNGKey(1), (N, feat_dim), jnp.float32)
    wf, bf = params["fcs"][0]
    got_fc = fc_block(xt, prep["fcs"][0], relu=True, with_sparsity=False)[:, :wf.shape[1]]
    ref_fc = jnp.maximum(xt @ wf + bf, 0.0)
    assert bool(jnp.allclose(got_fc, ref_fc, atol=6e-2, rtol=6e-2))

    print("KERNEL_OK")
</pallas_src>

<mosaic_0001>
module attributes {stable_mosaic.version = 11 : i64} {
  func.func @_input_sparsity_kernel(%arg0: i32, %arg1: memref<64x128xf32, #tpu.memory_space<vmem>>, %arg2: memref<64x128xi8, #tpu.memory_space<vmem>>, %arg3: memref<1x1xi32, #tpu.memory_space<smem>>) attributes {dimension_semantics = [#tpu.dimension_semantics<parallel>], iteration_bounds = array<i64: 1>, scalar_prefetch = 0 : i64, scratch_operands = 0 : i64, tpu.core_type = #tpu.core_type<tc>, window_params = [{transform_indices = @transform_0, window_bounds = array<i64: 64, 128>}, {transform_indices = @transform_1, window_bounds = array<i64: 64, 128>}, {transform_indices = @transform_2, window_bounds = array<i64: 1, 1>}]} {
    %c0 = arith.constant 0 : index
    %c0_0 = arith.constant 0 : index
    %0 = vector.load %arg1[%c0, %c0_0] : memref<64x128xf32, #tpu.memory_space<vmem>>, vector<64x128xf32>
    %cst = arith.constant 0.000000e+00 : f32
    %1 = vector.broadcast %cst : f32 to vector<64x128xf32>
    %2 = arith.cmpf oeq, %0, %1 : vector<64x128xf32>
    %3 = arith.extui %2 : vector<64x128xi1> to vector<64x128xi8>
    %c0_1 = arith.constant 0 : index
    %c0_2 = arith.constant 0 : index
    %4 = vector.load %arg2[%c0_1, %c0_2] : memref<64x128xi8, #tpu.memory_space<vmem>>, vector<64x128xi8>
    tpu.vector_store %arg2[%c0_1, %c0_2], %3 {strides = array<i32>} : memref<64x128xi8, #tpu.memory_space<vmem>>, vector<64x128xi8>,
    %5 = arith.extui %2 : vector<64x128xi1> to vector<64x128xi32>
    %6 = vector.shape_cast %5 : vector<64x128xi32> to vector<1x64x128xi32>
    %cst_3 = arith.constant dense<0> : vector<1xi32>
    %7 = vector.multi_reduction <add>, %6, %cst_3 [1, 2] : vector<1x64x128xi32> to vector<1xi32>
    %8 = vector.shape_cast %7 : vector<1xi32> to vector<1x1x1xi32>
    %9 = vector.extract %8[0, 0, 0] : i32 from vector<1x1x1xi32>
    %c0_4 = arith.constant 0 : index
    %c0_5 = arith.constant 0 : index
    %10 = memref.load %arg3[%c0_4, %c0_5] : memref<1x1xi32, #tpu.memory_space<smem>>
    memref.store %9, %arg3[%c0_4, %c0_5] : memref<1x1xi32, #tpu.memory_space<smem>>
    return
  }
  func.func @transform_0(%arg0: i32) -> (i32, i32) {
    %c0_i32 = arith.constant 0 : i32
    %c0_i32_0 = arith.constant 0 : i32
    return %arg0, %c0_i32 : i32, i32
  }
  func.func @transform_1(%arg0: i32) -> (i32, i32) {
    %c0_i32 = arith.constant 0 : i32
    %c0_i32_0 = arith.constant 0 : i32
    return %arg0, %c0_i32 : i32, i32
  }
  func.func @transform_2(%arg0: i32) -> (i32, i32) {
    %c0_i32 = arith.constant 0 : i32
    %c0_i32_0 = arith.constant 0 : i32
    return %arg0, %c0_i32 : i32, i32
  }
}

</mosaic_0001>

<bundles_post_ra>
// kernel: tpu_custom_call.1
= control target key start
LH: loop header
LB: loop body
LE: loop exit
PB: predicated region body
PF: predicated region fallthrough
CT: control target
= control target key end

     0   :  { %8 = vsyncpa [#allocation3], 0  ;;  %s267_s0 = inlined_call_operand.hbm [shape: f32[64,128], index: 0, kind: input, shape index: {}]   ;;  %s268_s1 = inlined_call_operand.hbm [shape: s8[64,128], index: 1, kind: output, shape index: {0}]   ;;  %s269_s2 = inlined_call_operand.hbm [shape: s32[1,1], index: 2, kind: output, shape index: {1}]  }
   0x1   :  { %9 = vsyncpa [#allocation4], 0 }
   0x2   :  { %10 = vsyncpa [#allocation5], 0  ;;  %s188_s9 = smov [#allocation2]   ;;  %s128_s13 = scalar_lea.hbm %s267_s0, 1024 }
   0x3   :  { %s16_s10 = sshll.u32 %s188_s9, 4  ;;  %p129_p0 = scmp.ne.s32.totalorder %s267_s0, %s128_s13  ;;  %s17_s10 = int_to_ptr.vmem [resolvable:$true] %s16_s10 }
   0x4   :  { %p132_p1 = scmp.lt.u32.totalorder %s128_s13, %s267_s0 }
   0x6   :  { %p134_p2 = pnand %p132_p1, %p129_p0 }
   0x8   :  { %137 = shalt.err (!%p134_p2)
}
   0x9   :  { %s138_s18 = scalar_lea.vmem %s17_s10, 1024  ;;  %p143_p4 = scmp.lt.s32.totalorder %s17_s10, %s17_s10 }
   0xa   :  { %p139_p3 = scmp.ne.s32.totalorder %s17_s10, %s138_s18  ;;  %p144_p5 = scmp.lt.s32.totalorder %s138_s18, %s138_s18 }
   0xc   :  { %p145_p6 = por %p144_p5, %p143_p4 }
   0xe   :  { %p146_p7 = pnand %p145_p6, %p139_p3 }
  0x10   :  { %149 = shalt.err (!%p146_p7)
}
  0x11   :  { %s189_s19 = smov 128   ;;  %s190_s20 = smov 8  }
  0x12   :  { %22 = dma.hbm_to_vmem [thread:$0]  %s267_s0, 1024, %s17_s10, [#allocation3], %s189_s19, %s189_s19, %s190_s20  }
  0x13   :  { %182 = dma.done.wait [#allocation3], 1024  }
  0x14   :  { %183 = vsyncadd [#allocation3], 4294966272  ;;  %v28_v0 = vld [vmem:[#allocation2] sm:$0xff]  ;;  %v29_v1 = vld [vmem:[#allocation2 + $0x8] sm:$0xff]  ;;  %v191_v8 = vmov 0   ;;  %s192_s0 = smov [#allocation6]  }
  0x15   :  { %v30_v2 = vld [vmem:[#allocation2 + $0x10] sm:$0xff]  ;;  %v31_v3 = vld [vmem:[#allocation2 + $0x18] sm:$0xff]  ;;  %v32_v4 = vld [vmem:[#allocation2 + $0x20] sm:$0xff]  ;;  %vm36_vm0 = vcmp.eq.f32.partialorder %v28_v0, 0.0  ;;  %vm37_vm1 = vcmp.eq.f32.partialorder %v29_v1, 0.0  ;;  %s95_s23 = sshll.u32 %s192_s0, 4  ;;  %s96_s23 = int_to_ptr.vmem [resolvable:$true] %s95_s23 }
  0x16   :  { %v33_v5 = vld [vmem:[#allocation2 + $0x28] sm:$0xff]  ;;  %vm38_vm2 = vcmp.eq.f32.partialorder %v30_v2, 0.0  ;;  %v34_v6 = vld [vmem:[#allocation2 + $0x30] sm:$0xff]  ;;  %v35_v7 = vld [vmem:[#allocation2 + $0x38] sm:$0xff]  ;;  %vm39_vm3 = vcmp.eq.f32.partialorder %v31_v3, 0.0  ;;  %vm40_vm4 = vcmp.eq.f32.partialorder %v32_v4, 0.0  ;;  %p155_p9 = scmp.lt.s32.totalorder %s96_s23, %s96_s23 }
  0x17   :  { %vm41_vm5 = vcmp.eq.f32.partialorder %v33_v5, 0.0  ;;  %v54_v9 = vsel %vm36_vm0, 1, %v191_v8  ;;  %vm42_vm6 = vcmp.eq.f32.partialorder %v34_v6, 0.0  ;;  %vm43_vm7 = vcmp.eq.f32.partialorder %v35_v7, 0.0  ;;  %vm44_vm8 = vmpackc.low %vm37_vm1, %vm36_vm0  ;;  %s150_s24 = scalar_lea.vmem %s96_s23, 256 }
  0x18   :  { %v55_v10 = vsel %vm37_vm1, 1, %v191_v8  ;;  %v56_v11 = vsel %vm38_vm2, 1, %v191_v8  ;;  %v57_v12 = vsel %vm39_vm3, 1, %v191_v8  ;;  %v58_v13 = vsel %vm40_vm4, 1, %v191_v8  ;;  %vm45_vm9 = vmpackc.low %vm39_vm3, %vm38_vm2  ;;  %p151_p8 = scmp.ne.s32.totalorder %s96_s23, %s150_s24  ;;  %p156_p10 = scmp.lt.s32.totalorder %s150_s24, %s150_s24 }
  0x19   :  { %v59_v14 = vsel %vm41_vm5, 1, %v191_v8  ;;  %v60_v15 = vsel %vm42_vm6, 1, %v191_v8  ;;  %v61_v16 = vsel %vm43_vm7, 1, %v191_v8  ;;  %v62_v17 = vadd.s32 %v58_v13, %v54_v9  ;;  %vm46_vm10 = vmpackc.even %vm45_vm9, %vm44_vm8 }
  0x1a   :  { %v63_v18 = vadd.s32 %v59_v14, %v55_v10  ;;  %v64_v19 = vadd.s32 %v60_v15, %v56_v11  ;;  %v65_v20 = vadd.s32 %v61_v16, %v57_v12  ;;  %vm47_vm11 = vmpackc.low %vm41_vm5, %vm40_vm4  ;;  %v50_v28 = vsel %vm46_vm10, 16843009, %v191_v8  ;;  %p157_p11 = por %p156_p10, %p155_p9 }
  0x1b   :  { %vm48_vm12 = vmpackc.low %vm43_vm7, %vm42_vm6  ;;  %52 = vst [vmem:[#allocation6] sm:$0xff] %v50_v28 }
  0x1c   :  { %v66_v21 = vadd.s32 %v63_v18, %v62_v17  ;;  %v67_v22 = vadd.s32 %v65_v20, %v64_v19  ;;  %vm49_vm13 = vmpackc.even %vm48_vm12, %vm47_vm11  ;;  %p158_p12 = pnand %p157_p11, %p151_p8 }
  0x1d   :  { %v51_v29 = vsel %vm49_vm13, 16843009, %v191_v8 }
  0x1e   :  { %v68_v23 = vadd.s32 %v67_v22, %v66_v21  ;;  %53 = vst [vmem:[#allocation6 + $0x8] sm:$0xff] %v51_v29 }
  0x20   :  { %v70_v24 = vshrl.u32 %v68_v23, 16  ;;  %v69_v25 = vand.u32 65535, %v68_v23 }
  0x22   :  { %v72_v26 = vcvt.s32.f32 %v70_v24  ;;  %v71_v27 = vcvt.s32.f32 %v69_v25 }
  0x24   :  { %75 = vadd.xlane.f32.xlu0 %v72_v26 }
  0x28   :  { %73 = vadd.xlane.f32.xlu0 %v71_v27 }
  0x29   :  { %161 = shalt.err (!%p158_p12)
}
  0x2a   :  { %s162_s27 = scalar_lea.hbm %s268_s1, 256 }
  0x2b   :  { %p163_p13 = scmp.ne.s32.totalorder %s268_s1, %s162_s27  ;;  %p166_p0 = scmp.lt.u32.totalorder %s162_s27, %s268_s1 }
  0x2d   :  { %p168_p1 = pnand %p166_p0, %p163_p13 }
  0x2f   :  { %171 = shalt.err (!%p168_p1)
}
  0x30   :  { %101 = dma.vmem_to_hbm [thread:$0]  %s96_s23, 256, %s268_s1, [#allocation4], %s189_s19, %s189_s19, %s190_s20  }
  0x31   :  { %s172_s9 = scalar_lea.hbm %s269_s2, 16 }
  0x32   :  { %p173_p2 = scmp.ne.s32.totalorder %s269_s2, %s172_s9  ;;  %p176_p3 = scmp.lt.u32.totalorder %s172_s9, %s269_s2 }
  0x34   :  { %p178_p4 = pnand %p176_p3, %p173_p2 }
  0xb1   :  { %v76_v30 = vpop.xlane.xlu0 %75 }
  0xb2   :  { %v78_v31 = vcvt.f32.s32 %v76_v30 }
  0xb4   :  { %v79_v33 = vshll.u32 %v78_v31, 16 }
  0xb5   :  { %v74_v32 = vpop.xlane.xlu0 %73 }
  0xb6   :  { %v77_v34 = vcvt.f32.s32 %v74_v32 }
  0xb8   :  { %v80_v35 = vadd.s32 %v79_v33, %v77_v34 }
  0xba   :  { %v81_v36 = vrot.slane %v80_v35, 4 }
  0xbc   :  { %v82_v37 = vadd.s32 %v81_v36, %v80_v35 }
  0xbe   :  { %v83_v38 = vrot.slane %v82_v37, 2 }
  0xc0   :  { %v84_v39 = vadd.s32 %v83_v38, %v82_v37 }
  0xc2   :  { %v85_v40 = vrot.slane %v84_v39, 1 }
  0xc4   :  { %v86_v41 = vadd.s32 %v85_v40, %v84_v39 }
  0xc6   :  { %120 = vpush %v86_v41 }
  0xf7   :  { %s121_s6 = spop %120 }
  0xf8   :  { %89 = sst [smem:[#allocation7]] %s121_s6 }
  0xf9   :  { %181 = shalt.err (!%p178_p4)
}
  0xfa   :  { %s193_s13 = smov [#allocation7]  }
  0xfb   :  { %109 = dma.smem_to_hbm %s193_s13, 16, %s269_s2, [#allocation5]  }
  0xfc   :  { %184 = dma.done.wait [#allocation4], 256  }
  0xfd   :  { %185 = vsyncadd [#allocation4], 4294967040 }
  0xfe   :  { %186 = dma.done.wait [#allocation5], 16  }
  0xff   :  { %187 = vsyncadd [#allocation5], 4294967280 }
 0x100   :  { %116 = sfence }
 0x101   :  { %117 = vsyncpa [#allocation3], 1 }
 0x102   :  { %118 = vsyncpa [#allocation4], 1 }
 0x103   :  { %119 = vsyncpa [#allocation5], 1 }

</bundles_post_ra>
